<compile_context>
chip_gen: v7x
topology: tpu7x:2x2x1
jax: 0.10.0
libtpu: 0.0.40
codegen_flags: <defaults>
</compile_context>

<pallas_src>
import jax
import jax.numpy as jnp
from jax.experimental import pallas as pl
from jax.experimental.pallas import tpu as pltpu

FEAT = 128          # lane-padded feature width for every activation
HEAD_W = 2 * FEAT   # fused latent-head output width: [means | log_var]


def _round_up(x, m):
    return (x + m - 1) // m * m


def _make_vae_kernel(n_enc, n_dec):
    """Kernel refs: x, eps, W_all, b_all -> head_out, z_out, recon_out.

    W_all: (L, FEAT, HEAD_W), b_all: (L, HEAD_W), with layer order
    [encoder layers..., fused latent head, decoder layers...].
    Regular layers only use the first FEAT output columns of their slot.
    """

    def kernel(x_ref, eps_ref, w_ref, b_ref, head_ref, z_ref, recon_ref):
        b_all = b_ref[...]                         # (L, HEAD_W), tiny

        # ---- Encoder MLP: Linear + ReLU per layer (128-lane dense) ----
        h = x_ref[...]                             # (bt, FEAT)
        for l in range(n_enc):
            w = w_ref[l][:, :FEAT]                 # (FEAT, FEAT), 128-aligned slice
            b = b_all[l:l + 1, :FEAT]              # (1, FEAT)
            h = jnp.maximum(
                jnp.dot(h, w, preferred_element_type=jnp.float32) + b, 0.0)

        # ---- Fused latent heads: one (FEAT, 2*FEAT) matmul ----
        hw = w_ref[n_enc]                          # (FEAT, HEAD_W)
        hb = b_all[n_enc:n_enc + 1, :]             # (1, HEAD_W)
        head = jnp.dot(h, hw, preferred_element_type=jnp.float32) + hb
        means_slab = head[:, :FEAT]                # means in lanes [0:latent)
        logvar_slab = head[:, FEAT:]               # log_var in lanes [0:latent)

        # ---- Reparameterize: z = mu + eps * exp(0.5 * log_var) ----
        # eps is zero outside the valid latent lanes, so padded lanes of z
        # stay exactly zero (exp(0) * 0 == 0).
        z_slab = means_slab + eps_ref[...] * jnp.exp(0.5 * logvar_slab)

        # ---- Decoder MLP: ReLU after every linear (sigmoid branch is dead
        #      code in the reference module and therefore never applied) ----
        d = z_slab
        for l in range(n_dec):
            li = n_enc + 1 + l
            w = w_ref[li][:, :FEAT]
            b = b_all[li:li + 1, :FEAT]
            d = jnp.maximum(
                jnp.dot(d, w, preferred_element_type=jnp.float32) + b, 0.0)

        # ---- Lane-dense output stores ----
        head_ref[...] = head                       # (bt, 2*FEAT): means|log_var
        z_ref[...] = z_slab                        # (bt, FEAT)
        recon_ref[...] = d                         # (bt, FEAT)

    return kernel


def _pad_linear(w, b):
    """(in,out) weight / (out,) bias -> (FEAT, HEAD_W) / (HEAD_W,) zero-padded."""
    in_s, out_s = w.shape
    wp = jnp.zeros((FEAT, HEAD_W), jnp.float32).at[:in_s, :out_s].set(w)
    bp = jnp.zeros((HEAD_W,), jnp.float32).at[:out_s].set(b)
    return wp, bp


def vae_forward(x, eps, enc_layers, mean_head, logvar_head, dec_layers,
                *, batch_tile=256):
    """enc_layers / dec_layers: list of (W[in,out], b[out]).
    mean_head / logvar_head: (W[in,out], b[out]).  Returns
    (recon_x, means, log_var, z), matching the PyTorch VAE.forward order."""
    n_enc, n_dec = len(enc_layers), len(dec_layers)
    batch, in_dim = x.shape
    latent = mean_head[0].shape[1]
    recon_dim = dec_layers[-1][0].shape[1]
    assert in_dim <= FEAT and latent <= FEAT and recon_dim <= FEAT

    # --- Pack all parameters into one stacked weight / bias tensor ---
    packed_w, packed_b = [], []
    for w, b in enc_layers:
        wp, bp = _pad_linear(w, b)
        packed_w.append(wp)
        packed_b.append(bp)
    # Fused latent head: means -> lanes [0:latent), log_var -> [FEAT:FEAT+latent)
    wm, bm = mean_head
    wv, bv = logvar_head
    enc_out = wm.shape[0]
    wh = jnp.zeros((FEAT, HEAD_W), jnp.float32)
    wh = wh.at[:enc_out, :latent].set(wm).at[:enc_out, FEAT:FEAT + latent].set(wv)
    bh = jnp.zeros((HEAD_W,), jnp.float32)
    bh = bh.at[:latent].set(bm).at[FEAT:FEAT + latent].set(bv)
    packed_w.append(wh)
    packed_b.append(bh)
    for w, b in dec_layers:
        wp, bp = _pad_linear(w, b)
        packed_w.append(wp)
        packed_b.append(bp)
    w_all = jnp.stack(packed_w)          # (L, FEAT, HEAD_W)
    b_all = jnp.stack(packed_b)          # (L, HEAD_W)
    n_layers = w_all.shape[0]

    # --- Lane/sublane-pad the batch inputs and pick a batch tile ---
    bt = min(batch_tile, _round_up(batch, 8))
    b_pad = _round_up(batch, bt)
    x_p = jnp.zeros((b_pad, FEAT), jnp.float32).at[:batch, :in_dim].set(x)
    eps_p = jnp.zeros((b_pad, FEAT), jnp.float32).at[:batch, :latent].set(eps)
    grid = (b_pad // bt,)

    kernel = _make_vae_kernel(n_enc, n_dec)

    head_out, z_out, recon_out = pl.pallas_call(
        kernel,
        out_shape=(
            jax.ShapeDtypeStruct((b_pad, HEAD_W), jnp.float32),  # means|log_var
            jax.ShapeDtypeStruct((b_pad, FEAT), jnp.float32),    # z slab
            jax.ShapeDtypeStruct((b_pad, FEAT), jnp.float32),    # recon slab
        ),
        grid=grid,
        in_specs=[
            pl.BlockSpec((bt, FEAT), lambda i: (i, 0)),                    # x
            pl.BlockSpec((bt, FEAT), lambda i: (i, 0)),                    # eps
            pl.BlockSpec((n_layers, FEAT, HEAD_W), lambda i: (0, 0, 0)),   # W (resident)
            pl.BlockSpec((n_layers, HEAD_W), lambda i: (0, 0)),            # b (resident)
        ],
        out_specs=(
            pl.BlockSpec((bt, HEAD_W), lambda i: (i, 0)),
            pl.BlockSpec((bt, FEAT), lambda i: (i, 0)),
            pl.BlockSpec((bt, FEAT), lambda i: (i, 0)),
        ),
        compiler_params=pltpu.CompilerParams(
            dimension_semantics=("parallel",),
            vmem_limit_bytes=32 * 1024 * 1024,
        ),
    )(x_p, eps_p, w_all, b_all)

    recon_x = recon_out[:batch, :recon_dim]
    means = head_out[:batch, :latent]
    log_var = head_out[:batch, FEAT:FEAT + latent]
    z = z_out[:batch, :latent]
    return recon_x, means, log_var, z


if __name__ == "__main__":
    # Small shapes consistent with the module (non-conditional VAE):
    #   encoder_layer_sizes = [64, 32], latent_size = 16,
    #   decoder_layer_sizes = [16, 32, 64], batch = 8.
    encoder_layer_sizes = [64, 32]
    latent_size = 16
    decoder_layer_sizes = [16, 32, 64]
    batch = 8

    key = jax.random.PRNGKey(0)
    keys = jax.random.split(key, 16)

    def init_linear(k, in_size, out_size):
        kw, kb = jax.random.split(k)
        bound = 1.0 / jnp.sqrt(in_size)
        w = jax.random.uniform(kw, (in_size, out_size), jnp.float32, -bound, bound)
        b = jax.random.uniform(kb, (out_size,), jnp.float32, -bound, bound)
        return w, b

    enc_layers = []
    for i, (i_s, o_s) in enumerate(
            zip(encoder_layer_sizes[:-1], encoder_layer_sizes[1:])):
        enc_layers.append(init_linear(keys[i], i_s, o_s))
    mean_head = init_linear(keys[4], encoder_layer_sizes[-1], latent_size)
    logvar_head = init_linear(keys[5], encoder_layer_sizes[-1], latent_size)
    dec_layers = []
    for i, (i_s, o_s) in enumerate(
            zip(decoder_layer_sizes[:-1], decoder_layer_sizes[1:])):
        dec_layers.append(init_linear(keys[6 + i], i_s, o_s))

    # x is already 2-D (B, 64), so the 512*512 flatten branch is skipped.
    x = jax.random.normal(keys[12], (batch, encoder_layer_sizes[0]), jnp.float32)
    # eps plays the role of torch.randn_like(std) in reparameterize.
    eps = jax.random.normal(keys[13], (batch, latent_size), jnp.float32)

    recon_x, means, log_var, z = vae_forward(
        x, eps, enc_layers, mean_head, logvar_head, dec_layers)
    jax.block_until_ready((recon_x, means, log_var, z))

    # Sanity check against a plain-JAX reference of the same math.
    def ref_forward(x, eps):
        h = x
        for w, b in enc_layers:
            h = jnp.maximum(h @ w + b, 0.0)
        m = h @ mean_head[0] + mean_head[1]
        lv = h @ logvar_head[0] + logvar_head[1]
        zz = m + eps * jnp.exp(0.5 * lv)
        d = zz
        for w, b in dec_layers:
            d = jnp.maximum(d @ w + b, 0.0)
        return d, m, lv, zz

    r_ref, m_ref, lv_ref, z_ref = ref_forward(x, eps)
    assert jnp.allclose(recon_x, r_ref, atol=1e-4, rtol=1e-4)
    assert jnp.allclose(means, m_ref, atol=1e-4, rtol=1e-4)
    assert jnp.allclose(log_var, lv_ref, atol=1e-4, rtol=1e-4)
    assert jnp.allclose(z, z_ref, atol=1e-4, rtol=1e-4)

    print("KERNEL_OK")
</pallas_src>

<mosaic_0001>
module attributes {stable_mosaic.version = 11 : i64} {
  func.func @kernel(%arg0: i32, %arg1: memref<8x128xf32, #tpu.memory_space<vmem>>, %arg2: memref<8x128xf32, #tpu.memory_space<vmem>>, %arg3: memref<4x128x256xf32, #tpu.memory_space<vmem>>, %arg4: memref<4x256xf32, #tpu.memory_space<vmem>>, %arg5: memref<8x256xf32, #tpu.memory_space<vmem>>, %arg6: memref<8x128xf32, #tpu.memory_space<vmem>>, %arg7: memref<8x128xf32, #tpu.memory_space<vmem>>) attributes {dimension_semantics = [#tpu.dimension_semantics<parallel>], iteration_bounds = array<i64: 1>, scalar_prefetch = 0 : i64, scratch_operands = 0 : i64, tpu.core_type = #tpu.core_type<tc>, window_params = [{transform_indices = @transform_0, window_bounds = array<i64: 8, 128>}, {transform_indices = @transform_1, window_bounds = array<i64: 8, 128>}, {pipeline_mode = #tpu.pipeline_mode<synchronous>, transform_indices = @transform_2, window_bounds = array<i64: 4, 128, 256>}, {pipeline_mode = #tpu.pipeline_mode<synchronous>, transform_indices = @transform_3, window_bounds = array<i64: 4, 256>}, {transform_indices = @transform_4, window_bounds = array<i64: 8, 256>}, {transform_indices = @transform_5, window_bounds = array<i64: 8, 128>}, {transform_indices = @transform_6, window_bounds = array<i64: 8, 128>}]} {
    %c0 = arith.constant 0 : index
    %c0_0 = arith.constant 0 : index
    %0 = vector.load %arg4[%c0, %c0_0] : memref<4x256xf32, #tpu.memory_space<vmem>>, vector<4x256xf32>
    %c0_1 = arith.constant 0 : index
    %c0_2 = arith.constant 0 : index
    %1 = vector.load %arg1[%c0_1, %c0_2] : memref<8x128xf32, #tpu.memory_space<vmem>>, vector<8x128xf32>
    %c0_3 = arith.constant 0 : index
    %c0_4 = arith.constant 0 : index
    %c0_5 = arith.constant 0 : index
    %2 = vector.load %arg3[%c0_3, %c0_4, %c0_5] : memref<4x128x256xf32, #tpu.memory_space<vmem>>, vector<1x128x256xf32>
    %3 = vector.shape_cast %2 : vector<1x128x256xf32> to vector<128x256xf32>
    %4 = vector.extract_strided_slice %3 {offsets = [0, 0], sizes = [128, 128], strides = [1, 1]} : vector<128x256xf32> to vector<128x128xf32>
    %5 = vector.extract_strided_slice %0 {offsets = [0, 0], sizes = [1, 128], strides = [1, 1]} : vector<4x256xf32> to vector<1x128xf32>
    %cst = arith.constant dense<0.000000e+00> : vector<8x128xf32>
    %6 = tpu.matmul %1, %4, %cst {dimension_numbers = #tpu.dot_dimension_numbers<[1], [0], [0], [1], [0, 0, 1, 1], [], []>} : vector<8x128xf32>, vector<128x128xf32>, vector<8x128xf32> -> vector<8x128xf32>
    %7 = vector.broadcast %5 : vector<1x128xf32> to vector<8x128xf32>
    %8 = arith.addf %6, %7 : vector<8x128xf32>
    %cst_6 = arith.constant 0.000000e+00 : f32
    %9 = vector.broadcast %cst_6 : f32 to vector<8x128xf32>
    %10 = arith.maximumf %8, %9 : vector<8x128xf32>
    %c1 = arith.constant 1 : index
    %c0_7 = arith.constant 0 : index
    %c0_8 = arith.constant 0 : index
    %11 = vector.load %arg3[%c1, %c0_7, %c0_8] : memref<4x128x256xf32, #tpu.memory_space<vmem>>, vector<1x128x256xf32>
    %12 = vector.shape_cast %11 : vector<1x128x256xf32> to vector<128x256xf32>
    %13 = vector.extract_strided_slice %0 {offsets = [1, 0], sizes = [1, 256], strides = [1, 1]} : vector<4x256xf32> to vector<1x256xf32>
    %cst_9 = arith.constant dense<0.000000e+00> : vector<8x256xf32>
    %14 = tpu.matmul %10, %12, %cst_9 {dimension_numbers = #tpu.dot_dimension_numbers<[1], [0], [0], [1], [0, 0, 1, 1], [], []>} : vector<8x128xf32>, vector<128x256xf32>, vector<8x256xf32> -> vector<8x256xf32>
    %15 = vector.broadcast %13 : vector<1x256xf32> to vector<8x256xf32>
    %16 = arith.addf %14, %15 : vector<8x256xf32>
    %17 = vector.extract_strided_slice %16 {offsets = [0, 0], sizes = [8, 128], strides = [1, 1]} : vector<8x256xf32> to vector<8x128xf32>
    %18 = vector.extract_strided_slice %16 {offsets = [0, 128], sizes = [8, 128], strides = [1, 1]} : vector<8x256xf32> to vector<8x128xf32>
    %c0_10 = arith.constant 0 : index
    %c0_11 = arith.constant 0 : index
    %19 = vector.load %arg2[%c0_10, %c0_11] : memref<8x128xf32, #tpu.memory_space<vmem>>, vector<8x128xf32>
    %cst_12 = arith.constant 5.000000e-01 : f32
    %20 = vector.broadcast %cst_12 : f32 to vector<8x128xf32>
    %21 = arith.mulf %20, %18 : vector<8x128xf32>
    %22 = math.exp %21 : vector<8x128xf32>
    %23 = arith.mulf %19, %22 : vector<8x128xf32>
    %24 = arith.addf %17, %23 : vector<8x128xf32>
    %c2 = arith.constant 2 : index
    %c0_13 = arith.constant 0 : index
    %c0_14 = arith.constant 0 : index
    %25 = vector.load %arg3[%c2, %c0_13, %c0_14] : memref<4x128x256xf32, #tpu.memory_space<vmem>>, vector<1x128x256xf32>
    %26 = vector.shape_cast %25 : vector<1x128x256xf32> to vector<128x256xf32>
    %27 = vector.extract_strided_slice %26 {offsets = [0, 0], sizes = [128, 128], strides = [1, 1]} : vector<128x256xf32> to vector<128x128xf32>
    %28 = vector.extract_strided_slice %0 {offsets = [2, 0], sizes = [1, 128], strides = [1, 1]} : vector<4x256xf32> to vector<1x128xf32>
    %cst_15 = arith.constant dense<0.000000e+00> : vector<8x128xf32>
    %29 = tpu.matmul %24, %27, %cst_15 {dimension_numbers = #tpu.dot_dimension_numbers<[1], [0], [0], [1], [0, 0, 1, 1], [], []>} : vector<8x128xf32>, vector<128x128xf32>, vector<8x128xf32> -> vector<8x128xf32>
    %30 = vector.broadcast %28 : vector<1x128xf32> to vector<8x128xf32>
    %31 = arith.addf %29, %30 : vector<8x128xf32>
    %cst_16 = arith.constant 0.000000e+00 : f32
    %32 = vector.broadcast %cst_16 : f32 to vector<8x128xf32>
    %33 = arith.maximumf %31, %32 : vector<8x128xf32>
    %c3 = arith.constant 3 : index
    %c0_17 = arith.constant 0 : index
    %c0_18 = arith.constant 0 : index
    %34 = vector.load %arg3[%c3, %c0_17, %c0_18] : memref<4x128x256xf32, #tpu.memory_space<vmem>>, vector<1x128x256xf32>
    %35 = vector.shape_cast %34 : vector<1x128x256xf32> to vector<128x256xf32>
    %36 = vector.extract_strided_slice %35 {offsets = [0, 0], sizes = [128, 128], strides = [1, 1]} : vector<128x256xf32> to vector<128x128xf32>
    %37 = vector.extract_strided_slice %0 {offsets = [3, 0], sizes = [1, 128], strides = [1, 1]} : vector<4x256xf32> to vector<1x128xf32>
    %cst_19 = arith.constant dense<0.000000e+00> : vector<8x128xf32>
    %38 = tpu.matmul %33, %36, %cst_19 {dimension_numbers = #tpu.dot_dimension_numbers<[1], [0], [0], [1], [0, 0, 1, 1], [], []>} : vector<8x128xf32>, vector<128x128xf32>, vector<8x128xf32> -> vector<8x128xf32>
    %39 = vector.broadcast %37 : vector<1x128xf32> to vector<8x128xf32>
    %40 = arith.addf %38, %39 : vector<8x128xf32>
    %cst_20 = arith.constant 0.000000e+00 : f32
    %41 = vector.broadcast %cst_20 : f32 to vector<8x128xf32>
    %42 = arith.maximumf %40, %41 : vector<8x128xf32>
    %c0_21 = arith.constant 0 : index
    %c0_22 = arith.constant 0 : index
    %43 = vector.load %arg5[%c0_21, %c0_22] : memref<8x256xf32, #tpu.memory_space<vmem>>, vector<8x256xf32>
    tpu.vector_store %arg5[%c0_21, %c0_22], %16 {strides = array<i32>} : memref<8x256xf32, #tpu.memory_space<vmem>>, vector<8x256xf32>,
    %c0_23 = arith.constant 0 : index
    %c0_24 = arith.constant 0 : index
    %44 = vector.load %arg6[%c0_23, %c0_24] : memref<8x128xf32, #tpu.memory_space<vmem>>, vector<8x128xf32>
    tpu.vector_store %arg6[%c0_23, %c0_24], %24 {strides = array<i32>} : memref<8x128xf32, #tpu.memory_space<vmem>>, vector<8x128xf32>,
    %c0_25 = arith.constant 0 : index
    %c0_26 = arith.constant 0 : index
    %45 = vector.load %arg7[%c0_25, %c0_26] : memref<8x128xf32, #tpu.memory_space<vmem>>, vector<8x128xf32>
    tpu.vector_store %arg7[%c0_25, %c0_26], %42 {strides = array<i32>} : memref<8x128xf32, #tpu.memory_space<vmem>>, vector<8x128xf32>,
    return
  }
  func.func @transform_0(%arg0: i32) -> (i32, i32) {
    %c0_i32 = arith.constant 0 : i32
    %c0_i32_0 = arith.constant 0 : i32
    return %arg0, %c0_i32 : i32, i32
  }
  func.func @transform_1(%arg0: i32) -> (i32, i32) {
    %c0_i32 = arith.constant 0 : i32
    %c0_i32_0 = arith.constant 0 : i32
    return %arg0, %c0_i32 : i32, i32
  }
  func.func @transform_2(%arg0: i32) -> (i32, i32, i32) {
    %c0_i32 = arith.constant 0 : i32
    %c0_i32_0 = arith.constant 0 : i32
    %c0_i32_1 = arith.constant 0 : i32
    %c0_i32_2 = arith.constant 0 : i32
    return %c0_i32, %c0_i32_0, %c0_i32_1 : i32, i32, i32
  }
  func.func @transform_3(%arg0: i32) -> (i32, i32) {
    %c0_i32 = arith.constant 0 : i32
    %c0_i32_0 = arith.constant 0 : i32
    %c0_i32_1 = arith.constant 0 : i32
    return %c0_i32, %c0_i32_0 : i32, i32
  }
  func.func @transform_4(%arg0: i32) -> (i32, i32) {
    %c0_i32 = arith.constant 0 : i32
    %c0_i32_0 = arith.constant 0 : i32
    return %arg0, %c0_i32 : i32, i32
  }
  func.func @transform_5(%arg0: i32) -> (i32, i32) {
    %c0_i32 = arith.constant 0 : i32
    %c0_i32_0 = arith.constant 0 : i32
    return %arg0, %c0_i32 : i32, i32
  }
  func.func @transform_6(%arg0: i32) -> (i32, i32) {
    %c0_i32 = arith.constant 0 : i32
    %c0_i32_0 = arith.constant 0 : i32
    return %arg0, %c0_i32 : i32, i32
  }
}

</mosaic_0001>

<bundles_post_ra>
// kernel: tpu_custom_call.1
= control target key start
LH: loop header
LB: loop body
LE: loop exit
PB: predicated region body
PF: predicated region fallthrough
CT: control target
= control target key end

     0   :  { %12 = vsyncpa [#allocation3], 0  ;;  %s1091_s0 = inlined_call_operand.hbm [shape: f32[8,128], index: 0, kind: input, shape index: {}]   ;;  %s1092_s1 = inlined_call_operand.hbm [shape: f32[8,128], index: 1, kind: input, shape index: {}]   ;;  %s1093_s2 = inlined_call_operand.hbm [shape: f32[4,128,256], index: 2, kind: input, shape index: {}]   ;;  %s1094_s3 = inlined_call_operand.vmem [shape: f32[4,256], index: 3, kind: input, shape index: {}]   ;;  %s1095_s4 = inlined_call_operand.hbm [shape: f32[8,256], index: 4, kind: output, shape index: {0}]   ;;  %s1096_s5 = inlined_call_operand.hbm [shape: f32[8,128], index: 5, kind: output, shape index: {1}]   ;;  %s1097_s6 = inlined_call_operand.hbm [shape: f32[8,128], index: 6, kind: output, shape index: {2}]  }
   0x1   :  { %13 = vsyncpa [#allocation6], 0 }
   0x2   :  { %14 = vsyncpa [#allocation4], 0 }
   0x3   :  { %15 = vsyncpa [#allocation10], 0  ;;  %s925_s21 = smov [#allocation5]   ;;  %s926_s23 = smov [#allocation2]  }
   0x4   :  { %s32_s22 = sshll.u32 %s925_s21, 4  ;;  %s22_s24 = sshll.u32 %s926_s23, 4  ;;  %s33_s22 = int_to_ptr.vmem [resolvable:$true] %s32_s22  ;;  %s23_s24 = int_to_ptr.vmem [resolvable:$true] %s22_s24 }
   0x5   :  { %s785_s27 = scalar_lea.hbm %s1092_s1, 128 }
   0x6   :  { %p786_p0 = scmp.ne.s32.totalorder %s1092_s1, %s785_s27  ;;  %p789_p1 = scmp.lt.u32.totalorder %s785_s27, %s1092_s1 }
   0x8   :  { %p791_p2 = pnand %p789_p1, %p786_p0 }
   0xa   :  { %794 = shalt.err (!%p791_p2)
}
   0xb   :  { %s795_s8 = scalar_lea.vmem %s33_s22, 128  ;;  %p800_p4 = scmp.lt.s32.totalorder %s33_s22, %s33_s22 }
   0xc   :  { %p796_p3 = scmp.ne.s32.totalorder %s33_s22, %s795_s8  ;;  %p801_p5 = scmp.lt.s32.totalorder %s795_s8, %s795_s8 }
   0xe   :  { %p802_p6 = por %p801_p5, %p800_p4 }
  0x10   :  { %p803_p7 = pnand %p802_p6, %p796_p3 }
  0x12   :  { %806 = shalt.err (!%p803_p7)
}
  0x13   :  { %35 = dma.hbm_to_vmem [thread:$0]  %s1092_s1, 128, %s33_s22, [#allocation6]  }
  0x14   :  { %s807_s13 = scalar_lea.hbm %s1091_s0, 128 }
  0x15   :  { %p808_p8 = scmp.ne.s32.totalorder %s1091_s0, %s807_s13  ;;  %p811_p9 = scmp.lt.u32.totalorder %s807_s13, %s1091_s0 }
  0x17   :  { %p813_p10 = pnand %p811_p9, %p808_p8 }
  0x19   :  { %816 = shalt.err (!%p813_p10)
}
  0x1a   :  { %s817_s18 = scalar_lea.vmem %s23_s24, 128  ;;  %p822_p12 = scmp.lt.s32.totalorder %s23_s24, %s23_s24 }
  0x1b   :  { %p818_p11 = scmp.ne.s32.totalorder %s23_s24, %s817_s18  ;;  %p823_p13 = scmp.lt.s32.totalorder %s817_s18, %s817_s18 }
  0x1d   :  { %p824_p0 = por %p823_p13, %p822_p12 }
  0x1f   :  { %p825_p1 = pnand %p824_p0, %p818_p11 }
  0x21   :  { %828 = shalt.err (!%p825_p1)
}
  0x22   :  { %25 = dma.hbm_to_vmem [thread:$0]  %s1091_s0, 128, %s23_s24, [#allocation3]  }
  0x23   :  { %s927_s20 = smov [#allocation7]   ;;  %s829_s25 = scalar_lea.hbm %s1093_s2, 16384 }
  0x24   :  { %s41_s21 = sshll.u32 %s927_s20, 4  ;;  %p830_p2 = scmp.ne.s32.totalorder %s1093_s2, %s829_s25  ;;  %s42_s21 = int_to_ptr.vmem [resolvable:$true] %s41_s21 }
  0x25   :  { %p833_p3 = scmp.lt.u32.totalorder %s829_s25, %s1093_s2 }
  0x27   :  { %p835_p4 = pnand %p833_p3, %p830_p2 }
  0x29   :  { %838 = shalt.err (!%p835_p4)
}
  0x2a   :  { %s839_s30 = scalar_lea.vmem %s42_s21, 16384  ;;  %p844_p6 = scmp.lt.s32.totalorder %s42_s21, %s42_s21 }
  0x2b   :  { %p840_p5 = scmp.ne.s32.totalorder %s42_s21, %s839_s30  ;;  %p845_p7 = scmp.lt.s32.totalorder %s839_s30, %s839_s30 }
  0x2d   :  { %p846_p8 = por %p845_p7, %p844_p6 }
  0x2f   :  { %p847_p9 = pnand %p846_p8, %p840_p5 }
  0x31   :  { %850 = shalt.err (!%p847_p9)
}
  0x32   :  { %s928_s0 = smov 256   ;;  %s929_s24 = smov 16  }
  0x33   :  { %47 = dma.hbm_to_vmem [thread:$0]  %s1093_s2, 16384, %s42_s21, [#allocation6], %s928_s0, %s928_s0, %s929_s24  }
  0x34   :  { %917 = dma.done.wait [#allocation3], 128  }
  0x35   :  { %918 = vsyncadd [#allocation3], 4294967168 }
  0x36   :  { %919 = dma.done.wait [#allocation6], 16512  }
  0x37   :  { %920 = vsyncadd [#allocation6], 4294950784  ;;  %v930_v0 = vmov 0.0|0.0   ;;  %vm931_vm0 = vmmov 0   ;;  %v932_v1 = vmov 0.0   ;;  %v61_v2 = vld [vmem:[#allocation7] sm:$0xff] }
  0x38   :  { %668 = vmatprep.subr.bf16.mxu0 %v930_v0  ;;  %595 = vmatprep.mubr.msk.f32.mxu0 %vm931_vm0, %v932_v1  ;;  %v62_v3 = vld [vmem:[#allocation7 + $0x10] sm:$0xff]  ;;  %v63_v4 = vld [vmem:[#allocation7 + $0x20] sm:$0xff]  ;;  %v154_v10 = vld [vmem:[#allocation7 + $0x108] sm:$0xff]  ;;  %s934_s11 = smov [#allocation8]  }
  0x39   :  { %268 = vmatprep.mubr.f32.mxu1 %v932_v1  ;;  %v669_v5 = vpack.c.bf16 %v62_v3, %v61_v2  ;;  %v64_v6 = vld [vmem:[#allocation7 + $0x30] sm:$0xff]  ;;  %v65_v8 = vld [vmem:[#allocation7 + $0x40] sm:$0xff]  ;;  %v156_v13 = vld [vmem:[#allocation7 + $0x118] sm:$0xff]  ;;  %s475_s12 = sshll.u32 %s934_s11, 4  ;;  %s476_s12 = int_to_ptr.vmem [resolvable:$true] %s475_s12 }
  0x3a   :  { %v672_v7 = vpack.c.bf16 %v64_v6, %v63_v4  ;;  %v66_v9 = vld [vmem:[#allocation7 + $0x50] sm:$0xff]  ;;  %v67_v11 = vld [vmem:[#allocation7 + $0x60] sm:$0xff]  ;;  %v692_v17 = vpack.c.bf16 %v156_v13, %v154_v10  ;;  %v158_v19 = vld [vmem:[#allocation7 + $0x128] sm:$0xff] }
  0x3b   :  { %670 = vmatpush3.bf16.msra.mxu0 %v669_v5  ;;  %v68_v12 = vld [vmem:[#allocation7 + $0x70] sm:$0xff]  ;;  %v153_v14 = vld [vmem:[#allocation7 + $0x100] sm:$0xff]  ;;  %v675_v16 = vpack.c.bf16 %v66_v9, %v65_v8  ;;  %v160_v20 = vld [vmem:[#allocation7 + $0x138] sm:$0xff] }
  0x3c   :  { %671 = vmatprep.subr.bf16.mxu0 %v930_v0  ;;  %v155_v15 = vld [vmem:[#allocation7 + $0x110] sm:$0xff]  ;;  %v157_v21 = vld [vmem:[#allocation7 + $0x120] sm:$0xff]  ;;  %v696_v22 = vpack.c.bf16 %v160_v20, %v158_v19  ;;  %v162_v24 = vld [vmem:[#allocation7 + $0x148] sm:$0xff]  ;;  %693 = vmatprep.subr.bf16.mxu1 %v692_v17  ;;  %v678_v27 = vpack.c.bf16 %v68_v12, %v67_v11  ;;  %v77_v19 = vlaneseq }
  0x3d   :  { %v694_v18 = vpack.c.bf16 %v155_v15, %v153_v14  ;;  %v159_v23 = vld [vmem:[#allocation7 + $0x130] sm:$0xff]  ;;  %v164_v25 = vld [vmem:[#allocation7 + $0x158] sm:$0xff]  ;;  %v69_v28 = vld [vmem:[#allocation7 + $0x80] sm:$0xff] }
  0x3e   :  { %v698_v26 = vpack.c.bf16 %v159_v23, %v157_v21  ;;  %v700_v29 = vpack.c.bf16 %v164_v25, %v162_v24  ;;  %v161_v30 = vld [vmem:[#allocation7 + $0x140] sm:$0xff]  ;;  %v163_v31 = vld [vmem:[#allocation7 + $0x150] sm:$0xff]  ;;  %v166_v33 = vld [vmem:[#allocation7 + $0x168] sm:$0xff]  ;;  %v1024_v20 = vshrl.u32 %v77_v19, 7 }
  0x3f   :  { %673 = vmatpush3.bf16.msra.mxu0 %v672_v7  ;;  %695 = vmatpush1.bf16.msra.mxu1 %v694_v18  ;;  %v70_v32 = vld [vmem:[#allocation7 + $0x90] sm:$0xff]  ;;  %v168_v34 = vld [vmem:[#allocation7 + $0x178] sm:$0xff]  ;;  %v702_v35 = vpack.c.bf16 %v163_v31, %v161_v30  ;;  %v71_v37 = vld [vmem:[#allocation7 + $0xa0] sm:$0xff] }
  0x40   :  { %674 = vmatprep.subr.bf16.mxu0 %v930_v0  ;;  %697 = vmatprep.subr.bf16.mxu1 %v696_v22  ;;  %v681_v36 = vpack.c.bf16 %v70_v32, %v69_v28  ;;  %v704_v38 = vpack.c.bf16 %v168_v34, %v166_v33  ;;  %v165_v39 = vld [vmem:[#allocation7 + $0x160] sm:$0xff]  ;;  %v167_v40 = vld [vmem:[#allocation7 + $0x170] sm:$0xff]  ;;  %v170_v42 = vld [vmem:[#allocation7 + $0x188] sm:$0xff]  ;;  %v79_v21 = vsub.s32 0, %v1024_v20 }
  0x41   :  { %v72_v41 = vld [vmem:[#allocation7 + $0xb0] sm:$0xff]  ;;  %v172_v43 = vld [vmem:[#allocation7 + $0x198] sm:$0xff]  ;;  %v706_v44 = vpack.c.bf16 %v167_v40, %v165_v39  ;;  %v73_v46 = vld [vmem:[#allocation7 + $0xc0] sm:$0xff] }
  0x42   :  { %v684_v45 = vpack.c.bf16 %v72_v41, %v71_v37  ;;  %v708_v47 = vpack.c.bf16 %v172_v43, %v170_v42  ;;  %v169_v48 = vld [vmem:[#allocation7 + $0x180] sm:$0xff]  ;;  %v171_v49 = vld [vmem:[#allocation7 + $0x190] sm:$0xff]  ;;  %v174_v51 = vld [vmem:[#allocation7 + $0x1a8] sm:$0xff] }
  0x43   :  { %676 = vmatpush3.bf16.msra.mxu0 %v675_v16  ;;  %699 = vmatpush1.bf16.msra.mxu1 %v698_v26  ;;  %v74_v50 = vld [vmem:[#allocation7 + $0xd0] sm:$0xff]  ;;  %v176_v52 = vld [vmem:[#allocation7 + $0x1b8] sm:$0xff]  ;;  %v710_v53 = vpack.c.bf16 %v171_v49, %v169_v48  ;;  %v75_v55 = vld [vmem:[#allocation7 + $0xe0] sm:$0xff] }
  0x44   :  { %677 = vmatprep.subr.bf16.mxu0 %v930_v0  ;;  %701 = vmatprep.subr.bf16.mxu1 %v700_v29  ;;  %v687_v54 = vpack.c.bf16 %v74_v50, %v73_v46  ;;  %v712_v56 = vpack.c.bf16 %v176_v52, %v174_v51  ;;  %v173_v57 = vld [vmem:[#allocation7 + $0x1a0] sm:$0xff]  ;;  %v175_v58 = vld [vmem:[#allocation7 + $0x1b0] sm:$0xff]  ;;  %v178_v60 = vld [vmem:[#allocation7 + $0x1c8] sm:$0xff] }
  0x45   :  { %v76_v59 = vld [vmem:[#allocation7 + $0xf0] sm:$0xff]  ;;  %v180_v61 = vld [vmem:[#allocation7 + $0x1d8] sm:$0xff]  ;;  %v714_v62 = vpack.c.bf16 %v175_v58, %v173_v57  ;;  %v177_v3 = vld [vmem:[#allocation7 + $0x1c0] sm:$0xff] }
  0x46   :  { %v690_v63 = vpack.c.bf16 %v76_v59, %v75_v55  ;;  %v716_v2 = vpack.c.bf16 %v180_v61, %v178_v60  ;;  %v179_v4 = vld [vmem:[#allocation7 + $0x1d0] sm:$0xff]  ;;  %v182_v7 = vld [vmem:[#allocation7 + $0x1e8] sm:$0xff]  ;;  %v184_v8 = vld [vmem:[#allocation7 + $0x1f8] sm:$0xff] }
  0x47   :  { %679 = vmatpush3.bf16.msra.mxu0 %v678_v27  ;;  %703 = vmatpush1.bf16.msra.mxu1 %v702_v35  ;;  %v718_v5 = vpack.c.bf16 %v179_v4, %v177_v3  ;;  %v60_v6 = vld [vmem:[#allocation2] sm:$0xff]  ;;  %v720_v9 = vpack.c.bf16 %v184_v8, %v182_v7  ;;  %v181_v10 = vld [vmem:[#allocation7 + $0x1e0] sm:$0xff]  ;;  %v188_v4 = vsub.s32 1, %v1024_v20 }
  0x48   :  { %680 = vmatprep.subr.bf16.mxu0 %v930_v0  ;;  %705 = vmatprep.subr.bf16.mxu1 %v704_v38  ;;  %v183_v11 = vld [vmem:[#allocation7 + $0x1f0] sm:$0xff]  ;;  %v282_v13 = vld [vmem:[#allocation7 + $0x200] sm:$0xff] }
  0x49   :  { %v722_v12 = vpack.c.bf16 %v183_v11, %v181_v10  ;;  %v283_v14 = vld [vmem:[#allocation7 + $0x210] sm:$0xff]  ;;  %v284_v15 = vld [vmem:[#allocation7 + $0x220] sm:$0xff] }
  0x4a   :  { %v725_v16 = vpack.c.bf16 %v283_v14, %v282_v13  ;;  %v285_v17 = vld [vmem:[#allocation7 + $0x230] sm:$0xff]  ;;  %v286_v28 = vld [vmem:[#allocation7 + $0x240] sm:$0xff] }
  0x4b   :  { %682 = vmatpush3.bf16.msra.mxu0 %v681_v36  ;;  %707 = vmatpush1.bf16.msra.mxu1 %v706_v44  ;;  %v728_v18 = vpack.c.bf16 %v285_v17, %v284_v15  ;;  %v1030_v22 = vld [vmem:[%s1094_s3] sm:$0xff]  ;;  %v288_v31 = vld [vmem:[#allocation7 + $0x260] sm:$0xff]  ;;  %s933_s3 = smov [#allocation9]  }
  0x4c   :  { %683 = vmatprep.subr.bf16.mxu0 %v930_v0  ;;  %709 = vmatprep.subr.bf16.mxu1 %v708_v47  ;;  %v80_v23 = vrot.slane %v1030_v22, %v79_v21  ;;  %v287_v29 = vld [vmem:[#allocation7 + $0x250] sm:$0xff]  ;;  %v290_v34 = vld [vmem:[#allocation7 + $0x280] sm:$0xff]  ;;  %s485_s10 = sshll.u32 %s933_s3, 4  ;;  %s486_s10 = int_to_ptr.vmem [resolvable:$true] %s485_s10 }
  0x4d   :  { %v731_v30 = vpack.c.bf16 %v287_v29, %v286_v28  ;;  %v289_v32 = vld [vmem:[#allocation7 + $0x270] sm:$0xff]  ;;  %v292_v37 = vld [vmem:[#allocation7 + $0x2a0] sm:$0xff]  ;;  %s851_s13 = scalar_lea.vmem %s486_s10, 128  ;;  %p856_p11 = scmp.lt.s32.totalorder %s486_s10, %s486_s10 }
  0x4e   :  { %v734_v33 = vpack.c.bf16 %v289_v32, %v288_v31  ;;  %v291_v35 = vld [vmem:[#allocation7 + $0x290] sm:$0xff]  ;;  %v294_v39 = vld [vmem:[#allocation7 + $0x2c0] sm:$0xff]  ;;  %p852_p10 = scmp.ne.s32.totalorder %s486_s10, %s851_s13  ;;  %p857_p12 = scmp.lt.s32.totalorder %s851_s13, %s851_s13 }
  0x4f   :  { %685 = vmatpush3.bf16.msra.mxu0 %v684_v45  ;;  %711 = vmatpush1.bf16.msra.mxu1 %v710_v53  ;;  %v737_v36 = vpack.c.bf16 %v291_v35, %v290_v34  ;;  %v293_v38 = vld [vmem:[#allocation7 + $0x2b0] sm:$0xff]  ;;  %v296_v42 = vld [vmem:[#allocation7 + $0x2e0] sm:$0xff] }
  0x50   :  { %686 = vmatprep.subr.bf16.mxu0 %v930_v0  ;;  %713 = vmatprep.subr.bf16.mxu1 %v712_v56  ;;  %v295_v40 = vld [vmem:[#allocation7 + $0x2d0] sm:$0xff]  ;;  %v374_v45 = vld [vmem:[#allocation7 + $0x300] sm:$0xff]  ;;  %p858_p13 = por %p857_p12, %p856_p11 }
  0x51   :  { %v743_v41 = vpack.c.bf16 %v295_v40, %v294_v39  ;;  %v297_v43 = vld [vmem:[#allocation7 + $0x2f0] sm:$0xff]  ;;  %v376_v47 = vld [vmem:[#allocation7 + $0x320] sm:$0xff] }
  0x52   :  { %v746_v44 = vpack.c.bf16 %v297_v43, %v296_v42  ;;  %v375_v46 = vld [vmem:[#allocation7 + $0x310] sm:$0xff]  ;;  %v378_v51 = vld [vmem:[#allocation7 + $0x340] sm:$0xff]  ;;  %p859_p0 = pnand %p858_p13, %p852_p10 }
  0x53   :  { %688 = vmatpush3.bf16.msra.mxu0 %v687_v54  ;;  %715 = vmatpush1.bf16.msra.mxu1 %v714_v62  ;;  %v749_v48 = vpack.c.bf16 %v375_v46, %v374_v45  ;;  %v377_v49 = vld [vmem:[#allocation7 + $0x330] sm:$0xff]  ;;  %v380_v54 = vld [vmem:[#allocation7 + $0x360] sm:$0xff] }
  0x54   :  { %689 = vmatprep.subr.bf16.mxu0 %v930_v0  ;;  %717 = vmatprep.subr.bf16.mxu1 %v716_v2  ;;  %v752_v50 = vpack.c.bf16 %v377_v49, %v376_v47  ;;  %v379_v52 = vld [vmem:[#allocation7 + $0x350] sm:$0xff]  ;;  %v382_v57 = vld [vmem:[#allocation7 + $0x380] sm:$0xff] }
  0x55   :  { %v755_v53 = vpack.c.bf16 %v379_v52, %v378_v51  ;;  %v381_v55 = vld [vmem:[#allocation7 + $0x370] sm:$0xff]  ;;  %v384_v60 = vld [vmem:[#allocation7 + $0x3a0] sm:$0xff] }
  0x56   :  { %v758_v56 = vpack.c.bf16 %v381_v55, %v380_v54  ;;  %v383_v58 = vld [vmem:[#allocation7 + $0x390] sm:$0xff]  ;;  %v388_v19 = vld [vmem:[#allocation7 + $0x3e0] sm:$0xff] }
  0x57   :  { %691 = vmatpush3.bf16.msra.mxu0 %v690_v63  ;;  %719 = vmatpush1.bf16.msra.mxu1 %v718_v5  ;;  %v761_v59 = vpack.c.bf16 %v383_v58, %v382_v57  ;;  %v385_v61 = vld [vmem:[#allocation7 + $0x3b0] sm:$0xff]  ;;  %v386_v63 = vld [vmem:[#allocation7 + $0x3c0] sm:$0xff]  ;;  %v192_v5 = vsub.s32 5, %v1024_v20 }
  0x58   :  { %724 = vmatprep.subr.bf16.mxu0 %v930_v0  ;;  %721 = vmatprep.subr.bf16.mxu1 %v720_v9  ;;  %v764_v62 = vpack.c.bf16 %v385_v61, %v384_v60  ;;  %v387_v2 = vld [vmem:[#allocation7 + $0x3d0] sm:$0xff] }
  0x59   :  { %v767_v3 = vpack.c.bf16 %v387_v2, %v386_v63  ;;  %v193_v7 = vrot.slane %v1030_v22, %v192_v5  ;;  %v389_v21 = vld [vmem:[#allocation7 + $0x3f0] sm:$0xff] }
  0x5a   :  { %596 = vmatmul.mubr.f32.vlgmr.msra.gmra.mrb[0].mxu0 %v60_v6  ;;  %v189_v6 = vrot.slane %v1030_v22, %v188_v4 }
  0x5b   :  { %630 = vmatprep.mubr.msk.f32.mxu0 %vm931_vm0, %v932_v1  ;;  %723 = vmatpush1.bf16.msra.mxu1 %v722_v12  ;;  %v203_v9 = vrot.slane %v193_v7, %v188_v4 }
  0x5c   :  { %748 = vmatprep.subr.bf16.mxu1 %v930_v0  ;;  %726 = vmatpush3.bf16.msra.mxu0 %v725_v16  ;;  %v199_v8 = vrot.slane %v189_v6, %v188_v4 }
  0x5d   :  { %727 = vmatprep.subr.bf16.mxu0 %v930_v0 }
  0x60   :  { %729 = vmatpush3.bf16.msra.mxu0 %v728_v18 }
  0x61   :  { %730 = vmatprep.subr.bf16.mxu0 %v930_v0 }
  0x64   :  { %732 = vmatpush3.bf16.msra.mxu0 %v731_v30 }
  0x65   :  { %733 = vmatprep.subr.bf16.mxu0 %v930_v0 }
  0x68   :  { %735 = vmatpush3.bf16.msra.mxu0 %v734_v33 }
  0x69   :  { %736 = vmatprep.subr.bf16.mxu0 %v930_v0 }
  0x6c   :  { %738 = vmatpush3.bf16.msra.mxu0 %v737_v36 }
  0x6d   :  { %739 = vmatprep.subr.bf16.mxu0 %v930_v0 }
 0x12d   :  { %v147_v24 = vpop.f32.mrb[0].mxu0 }
 0x12e   :  { %v148_v25 = vadd.f32 %v147_v24, %v80_v23  ;;  %v597_v26 = vpop.f32.mrb[1].mxu0  ;;  %v770_v23 = vpack.c.bf16 %v389_v21, %v388_v19  ;;  %v300_v24 = vsub.s32 2, %v1024_v20 }
 0x130   :  { %v151_v27 = vmax.f32 %v148_v25, 0.0  ;;  %v301_v25 = vrot.slane %v1030_v22, %v300_v24 }
 0x132   :  { %269 = vmatmul.mubr.f32.vlgmr.msra.gmra.mrb[0].mxu1 %v151_v27 }
 0x133   :  { %665 = vmatprep.mubr.msk.f32.mxu1 %vm931_vm0, %v932_v1  ;;  %v740_v1 = vpack.c.bf16 %v293_v38, %v292_v37  ;;  %750 = vmatpush3.bf16.msra.mxu1 %v749_v48 }
 0x134   :  { %751 = vmatprep.subr.bf16.mxu1 %v930_v0 }
 0x135   :  { %741 = vmatpush3.bf16.msra.mxu0 %v740_v1 }
 0x136   :  { %742 = vmatprep.subr.bf16.mxu0 %v930_v0 }
 0x137   :  { %753 = vmatpush3.bf16.msra.mxu1 %v752_v50 }
 0x138   :  { %754 = vmatprep.subr.bf16.mxu1 %v930_v0 }
 0x139   :  { %744 = vmatpush3.bf16.msra.mxu0 %v743_v41 }
 0x13a   :  { %745 = vmatprep.subr.bf16.mxu0 %v930_v0 }
 0x13b   :  { %756 = vmatpush3.bf16.msra.mxu1 %v755_v53 }
 0x13c   :  { %757 = vmatprep.subr.bf16.mxu1 %v930_v0 }
 0x13d   :  { %747 = vmatpush3.bf16.msra.mxu0 %v746_v44 }
 0x13f   :  { %759 = vmatpush3.bf16.msra.mxu1 %v758_v56 }
 0x140   :  { %760 = vmatprep.subr.bf16.mxu1 %v930_v0 }
 0x143   :  { %762 = vmatpush3.bf16.msra.mxu1 %v761_v59 }
 0x144   :  { %763 = vmatprep.subr.bf16.mxu1 %v930_v0 }
 0x147   :  { %765 = vmatpush3.bf16.msra.mxu1 %v764_v62 }
 0x148   :  { %766 = vmatprep.subr.bf16.mxu1 %v930_v0 }
 0x14b   :  { %768 = vmatpush3.bf16.msra.mxu1 %v767_v3 }
 0x14c   :  { %769 = vmatprep.subr.bf16.mxu1 %v930_v0  ;;  %v275_v0 = vld [vmem:[#allocation5] sm:$0xff] }
 0x14f   :  { %771 = vmatpush3.bf16.msra.mxu1 %v770_v23 }
 0x205   :  { %v270_v10 = vpop.f32.mrb[0].mxu1 }
 0x206   :  { %v271_v11 = vadd.f32 %v270_v10, %v199_v8  ;;  %v272_v12 = vpop.f32.mrb[1].mxu1 }
 0x207   :  { %v273_v13 = vadd.f32 %v272_v12, %v203_v9 }
 0x208   :  { %465 = vst [vmem:[#allocation8] sm:$0xff] %v271_v11 }
 0x209   :  { %v276_v14 = vmul.f32 0.5, %v273_v13  ;;  %466 = vst [vmem:[#allocation8 + $0x8] sm:$0xff] %v273_v13 }
 0x20b   :  { %v277_v15 = vmul.f32 1.442695, %v276_v14 }
 0x20d   :  { %783 = vpow2.f32 %v277_v15 }
 0x217   :  { %v784_v16 = vpop.eup %783 }
 0x218   :  { %v279_v17 = vmul.f32 %v784_v16, %v275_v0 }
 0x21a   :  { %v280_v18 = vadd.f32 %v279_v17, %v271_v11 }
 0x21c   :  { %631 = vmatmul.mubr.f32.vlgmr.msra.gmra.mrb[2].mxu0 %v280_v18  ;;  %467 = vst [vmem:[#allocation9] sm:$0xff] %v280_v18 }
 0x2ef   :  { %v368_v26 = vpop.f32.mrb[2].mxu0 }
 0x2f0   :  { %v369_v27 = vadd.f32 %v368_v26, %v301_v25  ;;  %v632_v28 = vpop.f32.mrb[3].mxu0 }
 0x2f2   :  { %v372_v29 = vmax.f32 %v369_v27, 0.0 }
 0x2f4   :  { %666 = vmatmul.mubr.f32.vlgmr.msra.gmra.mrb[2].mxu1 %v372_v29 }
 0x2f5   :  { %862 = shalt.err (!%p859_p0)
}
 0x2f6   :  { %s863_s16 = scalar_lea.hbm %s1096_s5, 128 }
 0x2f7   :  { %p864_p1 = scmp.ne.s32.totalorder %s1096_s5, %s863_s16  ;;  %p867_p2 = scmp.lt.u32.totalorder %s863_s16, %s1096_s5 }
 0x2f9   :  { %p869_p3 = pnand %p867_p2, %p864_p1 }
 0x2fb   :  { %872 = shalt.err (!%p869_p3)
}
 0x2fc   :  { %488 = dma.vmem_to_hbm [thread:$0]  %s486_s10, 128, %s1096_s5, [#allocation10]  }
 0x2fd   :  { %s873_s22 = scalar_lea.vmem %s476_s12, 256  ;;  %p878_p5 = scmp.lt.s32.totalorder %s476_s12, %s476_s12 }
 0x2fe   :  { %p874_p4 = scmp.ne.s32.totalorder %s476_s12, %s873_s22  ;;  %p879_p6 = scmp.lt.s32.totalorder %s873_s22, %s873_s22 }
 0x300   :  { %p880_p7 = por %p879_p6, %p878_p5 }
 0x302   :  { %p881_p8 = pnand %p880_p7, %p874_p4 }
 0x304   :  { %884 = shalt.err (!%p881_p8)
}
 0x305   :  { %s885_s26 = scalar_lea.hbm %s1095_s4, 256 }
 0x306   :  { %p886_p9 = scmp.ne.s32.totalorder %s1095_s4, %s885_s26  ;;  %p889_p10 = scmp.lt.u32.totalorder %s885_s26, %s1095_s4 }
 0x308   :  { %p891_p11 = pnand %p889_p10, %p886_p9 }
 0x30a   :  { %894 = shalt.err (!%p891_p11)
}
 0x30b   :  { %478 = dma.vmem_to_hbm [thread:$0]  %s476_s12, 256, %s1095_s4, [#allocation4]   ;;  %v392_v30 = vsub.s32 3, %v1024_v20 }
 0x30c   :  { %s935_s24 = smov [#allocation11]  }
 0x30d   :  { %v393_v31 = vrot.slane %v1030_v22, %v392_v30  ;;  %s495_s7 = sshll.u32 %s935_s24, 4  ;;  %s496_s7 = int_to_ptr.vmem [resolvable:$true] %s495_s7 }
 0x30e   :  { %s895_s8 = scalar_lea.vmem %s496_s7, 128  ;;  %p900_p13 = scmp.lt.s32.totalorder %s496_s7, %s496_s7 }
 0x30f   :  { %p896_p12 = scmp.ne.s32.totalorder %s496_s7, %s895_s8  ;;  %p901_p0 = scmp.lt.s32.totalorder %s895_s8, %s895_s8 }
 0x311   :  { %p902_p1 = por %p901_p0, %p900_p13 }
 0x313   :  { %p903_p2 = pnand %p902_p1, %p896_p12 }
 0x3c7   :  { %v460_v32 = vpop.f32.mrb[2].mxu1 }
 0x3c8   :  { %v461_v33 = vadd.f32 %v460_v32, %v393_v31  ;;  %v667_v34 = vpop.f32.mrb[3].mxu1 }
 0x3ca   :  { %v464_v35 = vmax.f32 %v461_v33, 0.0 }
 0x3cc   :  { %468 = vst [vmem:[#allocation11] sm:$0xff] %v464_v35 }
 0x3cd   :  { %906 = shalt.err (!%p903_p2)
}
 0x3ce   :  { %s907_s9 = scalar_lea.hbm %s1097_s6, 128 }
 0x3cf   :  { %p908_p3 = scmp.ne.s32.totalorder %s1097_s6, %s907_s9  ;;  %p911_p4 = scmp.lt.u32.totalorder %s907_s9, %s1097_s6 }
 0x3d1   :  { %p913_p5 = pnand %p911_p4, %p908_p3 }
 0x3d3   :  { %916 = shalt.err (!%p913_p5)
}
 0x3d4   :  { %498 = dma.vmem_to_hbm [thread:$0]  %s496_s7, 128, %s1097_s6, [#allocation10]  }
 0x3d5   :  { %921 = dma.done.wait [#allocation4], 256  }
 0x3d6   :  { %922 = vsyncadd [#allocation4], 4294967040 }
 0x3d7   :  { %923 = dma.done.wait [#allocation10], 256  }
 0x3d8   :  { %924 = vsyncadd [#allocation10], 4294967040 }
 0x3d9   :  { %508 = vsyncpa [#allocation3], 1 }
 0x3da   :  { %509 = vsyncpa [#allocation6], 1 }
 0x3db   :  { %510 = vsyncpa [#allocation4], 1 }
 0x3dc   :  { %511 = vsyncpa [#allocation10], 1 }

</bundles_post_ra>
